<compile_context>
chip_gen: v7x
topology: tpu7x:2x2x1
jax: 0.10.0
libtpu: 0.0.40
codegen_flags: <defaults>
</compile_context>

<pallas_src>
import numpy as np
import jax
import jax.numpy as jnp
from jax.experimental import pallas as pl
from jax.experimental.pallas import tpu as pltpu

LANE = 128


def _fsq_constants_np(levels, eps=1e-3):
    """Per-level FSQ constants, computed in float32 (matches the reference)."""
    lv = np.asarray(levels, dtype=np.float32)
    half_l = ((lv - 1.0) * np.float32(1.0 + eps) / 2.0).astype(np.float32)
    offset = np.where(np.asarray(levels, np.int64) % 2 == 0,
                      np.float32(0.5), np.float32(0.0)).astype(np.float32)
    shift = np.arctanh(offset / half_l).astype(np.float32)
    half_w = (np.asarray(levels, np.int64) // 2).astype(np.float32)
    basis = np.cumprod(
        np.concatenate([[1], np.asarray(levels[:-1], np.int64)])).astype(np.int64)
    return half_l, offset, shift, half_w, basis


def make_fsq_kernel(levels, dim, eps=1e-3):
    cd = len(levels)
    half_l_np, offset_np, shift_np, half_w_np, basis_np = _fsq_constants_np(levels, eps)
    # Per-level constants baked in as Python scalars (nothing captured as an
    # array constant, nothing rebuilt per tile).
    half_l = [float(v) for v in half_l_np]
    offset = [float(v) for v in offset_np]
    shift = [float(v) for v in shift_np]
    basis_f = [float(v) for v in basis_np]
    # sum_c half_width_c * basis_c folded into one compile-time constant.
    idx_const = float(np.sum(half_w_np * basis_np.astype(np.float32)))

    def kernel(x_ref, w_in_ref, b_in_ref, w_out_ref, b_out_ref, out_ref, idx_ref):
        # x_ref: (1, dim, S, 128) VMEM tile -- each channel slab x_ref[0, d] is
        # a full (S, 128) lane-dense block (full 8x128 vregs).
        # w_in (dim, cd), b_in (cd,), w_out (cd, dim) [pre-scaled by
        # 1/half_width], b_out (dim,) live in SMEM (scalar reads).
        slabs = [x_ref[0, d, :, :] for d in range(dim)]        # each (S, 128) f32

        out_acc = [None] * dim
        idx_acc = None
        for c in range(cd):
            # --- project_in for codebook channel c (unrolled VPU FMAs) ---
            z = slabs[0] * w_in_ref[0, c]
            for d in range(1, dim):
                z = z + slabs[d] * w_in_ref[d, c]
            # Fold bias + atanh shift into a single scalar, one vector add.
            z = z + (b_in_ref[c] + shift[c])

            # --- bound(): tanh(z + shift) * half_l - offset ---
            bounded = jnp.tanh(z) * half_l[c]
            if offset[c] != 0.0:
                bounded = bounded - offset[c]

            # --- round_ste forward (round-half-to-even, same as torch.round) ---
            q = jnp.round(bounded)                   # integer-valued f32

            # --- codebook index: f32 accumulation, exact (values << 2^24) ---
            contrib = q * basis_f[c] if basis_f[c] != 1.0 else q
            idx_acc = contrib if idx_acc is None else idx_acc + contrib

            # --- project_out (1/half_width folded into w_out rows) ---
            for d in range(dim):
                t = q * w_out_ref[c, d]
                out_acc[d] = t if out_acc[d] is None else out_acc[d] + t

        # Single convert per tile; values are exact non-negative integers.
        idx_ref[0, 0, :, :] = (idx_acc + idx_const).astype(jnp.int32)
        for d in range(dim):
            out_ref[0, d, :, :] = (out_acc[d] + b_out_ref[d]).astype(out_ref.dtype)

    return kernel


def _pick_row_tile(rows, dim, max_bytes=12 << 20):
    """Rows (of 128 tokens) per grid step.

    Sized so the double-buffered working set (in + out + idx) stays under
    ~12 MiB: safe under v5e's 16 MiB scoped-VMEM default and leaves ample
    pipelining headroom on v6e/v7x.  Always a multiple of 8 (sublane tiling).
    """
    per_row = 2 * LANE * (2 * dim + 1) * 4          # double-buffered bytes/row
    cap = max(8, (max_bytes // per_row) // 8 * 8)
    rows8 = ((rows + 7) // 8) * 8
    return min(rows8, cap)


def fsq_forward(x_nchw, w_in, b_in, w_out, b_out, levels, *, row_tile=None):
    """FSQ forward. x_nchw: [B, D, H, W]. Returns (out [B,D,H,W], indices [B,H,W])."""
    B, D, H, W = x_nchw.shape
    cd = len(levels)
    HW = H * W
    assert w_in.shape == (D, cd) and w_out.shape == (cd, D)

    # Lane-dense token layout: (B, D, R, 128) view of the NCHW slab.
    R = pl.cdiv(HW, LANE)                    # rows of 128 tokens
    S = row_tile if row_tile is not None else _pick_row_tile(R, D)
    Rp = ((R + S - 1) // S) * S              # pad rows so the tile divides evenly
    HWp = Rp * LANE

    x3 = x_nchw.reshape(B, D, HW)            # free reshape, no transpose
    if HWp != HW:
        x3 = jnp.pad(x3, ((0, 0), (0, 0), (0, HWp - HW)))
    x4 = x3.reshape(B, D, Rp, LANE)

    # Fold 1/half_width into project_out rows once (tiny (cd, D) op).
    _, _, _, half_w_np, _ = _fsq_constants_np(levels)
    w_out_scaled = (w_out / half_w_np[:, None]).astype(w_out.dtype)

    kernel = make_fsq_kernel(levels, D)

    tokens = B * HWp
    cost = pl.CostEstimate(
        flops=int(tokens * (4 * D * cd + 6 * cd + D)),
        transcendentals=int(tokens * cd),
        bytes_accessed=int(tokens * (2 * D + 1) * 4),
    )

    out4, idx4 = pl.pallas_call(
        kernel,
        out_shape=(jax.ShapeDtypeStruct((B, D, Rp, LANE), x_nchw.dtype),
                   jax.ShapeDtypeStruct((B, 1, Rp, LANE), jnp.int32)),
        grid_spec=pltpu.PrefetchScalarGridSpec(
            num_scalar_prefetch=0,
            grid=(B, Rp // S),
            in_specs=[
                pl.BlockSpec((1, D, S, LANE), lambda b, m: (b, 0, m, 0)),  # x tile
                pl.BlockSpec(memory_space=pltpu.MemorySpace.SMEM),   # w_in (D, cd)
                pl.BlockSpec(memory_space=pltpu.MemorySpace.SMEM),   # b_in (cd,)
                pl.BlockSpec(memory_space=pltpu.MemorySpace.SMEM),   # w_out/half_w (cd, D)
                pl.BlockSpec(memory_space=pltpu.MemorySpace.SMEM),   # b_out (D,)
            ],
            out_specs=[
                pl.BlockSpec((1, D, S, LANE), lambda b, m: (b, 0, m, 0)),  # quantized
                pl.BlockSpec((1, 1, S, LANE), lambda b, m: (b, 0, m, 0)),  # indices
            ],
        ),
        compiler_params=pltpu.CompilerParams(
            dimension_semantics=("parallel", "parallel"),
            vmem_limit_bytes=32 * 1024 * 1024),
        cost_estimate=cost,
    )(x4, w_in, b_in, w_out_scaled, b_out)

    out = out4.reshape(B, D, HWp)[:, :, :HW].reshape(B, D, H, W)
    indices = idx4.reshape(B, HWp)[:, :HW].reshape(B, H, W)
    return out, indices


def fsq_reference(x_nchw, w_in, b_in, w_out, b_out, levels, eps=1e-3):
    """Pure-JAX reference mirroring the PyTorch FSQ.forward semantics."""
    half_l, offset, shift, half_w, basis = _fsq_constants_np(levels, eps)
    half_l = jnp.asarray(half_l)
    offset = jnp.asarray(offset)
    shift = jnp.asarray(shift)
    half_w = jnp.asarray(half_w)
    basis_f = jnp.asarray(basis.astype(np.float32))

    B, D, H, W = x_nchw.shape
    zf = jnp.transpose(x_nchw, (0, 2, 3, 1)).reshape(-1, D)   # 'b d h w -> (b h w) d'
    z = zf @ w_in + b_in
    bounded = jnp.tanh(z + shift) * half_l - offset
    q = jnp.round(bounded)
    codes = q / half_w
    idx = jnp.sum((codes * half_w + half_w) * basis_f, axis=-1).astype(jnp.int32)
    out = codes @ w_out + b_out
    return (out.reshape(B, H, W, D).transpose(0, 3, 1, 2), idx.reshape(B, H, W))


if __name__ == "__main__":
    # Module config: FSQ(levels=[8,5,5], dim=4) -> has_projections=True,
    # num_codebooks=1, keep_num_codebooks_dim=False, return_indices=True.
    levels = (8, 5, 5)
    B, D, H, W = 2, 4, 16, 16
    cd = len(levels)

    key = jax.random.PRNGKey(0)
    kx, kwi, kbi, kwo, kbo = jax.random.split(key, 5)

    x = jax.random.normal(kx, (B, D, H, W), dtype=jnp.float32)

    # PyTorch Linear stores weight as [out, in]; we store the transposed
    # [in, out] so the math is x @ W.
    w_in = jax.random.normal(kwi, (D, cd), dtype=jnp.float32) * 0.5    # project_in
    b_in = jax.random.normal(kbi, (cd,), dtype=jnp.float32) * 0.1
    w_out = jax.random.normal(kwo, (cd, D), dtype=jnp.float32) * 0.5   # project_out
    b_out = jax.random.normal(kbo, (D,), dtype=jnp.float32) * 0.1

    out, idx = fsq_forward(x, w_in, b_in, w_out, b_out, levels)
    jax.block_until_ready((out, idx))

    # Sanity check against the pure-JAX reference.
    out_ref, idx_ref = fsq_reference(x, w_in, b_in, w_out, b_out, levels)
    assert out.shape == (B, D, H, W) and out.dtype == jnp.float32
    assert idx.shape == (B, H, W) and idx.dtype == jnp.int32
    np.testing.assert_allclose(np.asarray(out), np.asarray(out_ref),
                               rtol=1e-5, atol=1e-5)
    np.testing.assert_array_equal(np.asarray(idx), np.asarray(idx_ref))

    print("KERNEL_OK")
</pallas_src>

<mosaic_0001>
module attributes {stable_mosaic.version = 11 : i64} {
  func.func @kernel(%arg0: i32, %arg1: i32, %arg2: memref<1x4x8x128xf32, #tpu.memory_space<vmem>>, %arg3: memref<4x3xf32, #tpu.memory_space<smem>>, %arg4: memref<3xf32, #tpu.memory_space<smem>>, %arg5: memref<3x4xf32, #tpu.memory_space<smem>>, %arg6: memref<4xf32, #tpu.memory_space<smem>>, %arg7: memref<1x4x8x128xf32, #tpu.memory_space<vmem>>, %arg8: memref<1x1x8x128xi32, #tpu.memory_space<vmem>>) attributes {dimension_semantics = [#tpu.dimension_semantics<parallel>, #tpu.dimension_semantics<parallel>], iteration_bounds = array<i64: 2, 1>, scalar_prefetch = 0 : i64, scratch_operands = 0 : i64, tpu.core_type = #tpu.core_type<tc>, window_params = [{transform_indices = @transform_0, window_bounds = array<i64: 1, 4, 8, 128>}, {transform_indices = @transform_1, window_bounds = array<i64: 4, 3>}, {transform_indices = @transform_2, window_bounds = array<i64: 3>}, {transform_indices = @transform_3, window_bounds = array<i64: 3, 4>}, {transform_indices = @transform_4, window_bounds = array<i64: 4>}, {transform_indices = @transform_5, window_bounds = array<i64: 1, 4, 8, 128>}, {transform_indices = @transform_6, window_bounds = array<i64: 1, 1, 8, 128>}]} {
    %c0 = arith.constant 0 : index
    %c0_0 = arith.constant 0 : index
    %c0_1 = arith.constant 0 : index
    %c0_2 = arith.constant 0 : index
    %0 = vector.load %arg2[%c0, %c0_0, %c0_1, %c0_2] : memref<1x4x8x128xf32, #tpu.memory_space<vmem>>, vector<1x1x8x128xf32>
    %1 = vector.shape_cast %0 : vector<1x1x8x128xf32> to vector<8x128xf32>
    %c0_3 = arith.constant 0 : index
    %c1 = arith.constant 1 : index
    %c0_4 = arith.constant 0 : index
    %c0_5 = arith.constant 0 : index
    %2 = vector.load %arg2[%c0_3, %c1, %c0_4, %c0_5] : memref<1x4x8x128xf32, #tpu.memory_space<vmem>>, vector<1x1x8x128xf32>
    %3 = vector.shape_cast %2 : vector<1x1x8x128xf32> to vector<8x128xf32>
    %c0_6 = arith.constant 0 : index
    %c2 = arith.constant 2 : index
    %c0_7 = arith.constant 0 : index
    %c0_8 = arith.constant 0 : index
    %4 = vector.load %arg2[%c0_6, %c2, %c0_7, %c0_8] : memref<1x4x8x128xf32, #tpu.memory_space<vmem>>, vector<1x1x8x128xf32>
    %5 = vector.shape_cast %4 : vector<1x1x8x128xf32> to vector<8x128xf32>
    %c0_9 = arith.constant 0 : index
    %c3 = arith.constant 3 : index
    %c0_10 = arith.constant 0 : index
    %c0_11 = arith.constant 0 : index
    %6 = vector.load %arg2[%c0_9, %c3, %c0_10, %c0_11] : memref<1x4x8x128xf32, #tpu.memory_space<vmem>>, vector<1x1x8x128xf32>
    %7 = vector.shape_cast %6 : vector<1x1x8x128xf32> to vector<8x128xf32>
    %c0_12 = arith.constant 0 : index
    %c0_13 = arith.constant 0 : index
    %8 = memref.load %arg3[%c0_12, %c0_13] : memref<4x3xf32, #tpu.memory_space<smem>>
    %9 = vector.broadcast %8 : f32 to vector<8x128xf32>
    %10 = arith.mulf %1, %9 : vector<8x128xf32>
    %c1_14 = arith.constant 1 : index
    %c0_15 = arith.constant 0 : index
    %11 = memref.load %arg3[%c1_14, %c0_15] : memref<4x3xf32, #tpu.memory_space<smem>>
    %12 = vector.broadcast %11 : f32 to vector<8x128xf32>
    %13 = arith.mulf %3, %12 : vector<8x128xf32>
    %14 = arith.addf %10, %13 : vector<8x128xf32>
    %c2_16 = arith.constant 2 : index
    %c0_17 = arith.constant 0 : index
    %15 = memref.load %arg3[%c2_16, %c0_17] : memref<4x3xf32, #tpu.memory_space<smem>>
    %16 = vector.broadcast %15 : f32 to vector<8x128xf32>
    %17 = arith.mulf %5, %16 : vector<8x128xf32>
    %18 = arith.addf %14, %17 : vector<8x128xf32>
    %c3_18 = arith.constant 3 : index
    %c0_19 = arith.constant 0 : index
    %19 = memref.load %arg3[%c3_18, %c0_19] : memref<4x3xf32, #tpu.memory_space<smem>>
    %20 = vector.broadcast %19 : f32 to vector<8x128xf32>
    %21 = arith.mulf %7, %20 : vector<8x128xf32>
    %22 = arith.addf %18, %21 : vector<8x128xf32>
    %c0_20 = arith.constant 0 : index
    %23 = memref.load %arg4[%c0_20] : memref<3xf32, #tpu.memory_space<smem>>
    %cst = arith.constant 0.143695354 : f32
    %24 = arith.addf %23, %cst : f32
    %25 = vector.broadcast %24 : f32 to vector<8x128xf32>
    %26 = arith.addf %22, %25 : vector<8x128xf32>
    %27 = math.tanh %26 : vector<8x128xf32>
    %cst_21 = arith.constant 3.50350022 : f32
    %28 = vector.broadcast %cst_21 : f32 to vector<8x128xf32>
    %29 = arith.mulf %27, %28 : vector<8x128xf32>
    %cst_22 = arith.constant 5.000000e-01 : f32
    %30 = vector.broadcast %cst_22 : f32 to vector<8x128xf32>
    %31 = arith.subf %29, %30 : vector<8x128xf32>
    %32 = math.roundeven %31 : vector<8x128xf32>
    %c0_23 = arith.constant 0 : index
    %c0_24 = arith.constant 0 : index
    %33 = memref.load %arg5[%c0_23, %c0_24] : memref<3x4xf32, #tpu.memory_space<smem>>
    %34 = vector.broadcast %33 : f32 to vector<8x128xf32>
    %35 = arith.mulf %32, %34 : vector<8x128xf32>
    %c0_25 = arith.constant 0 : index
    %c1_26 = arith.constant 1 : index
    %36 = memref.load %arg5[%c0_25, %c1_26] : memref<3x4xf32, #tpu.memory_space<smem>>
    %37 = vector.broadcast %36 : f32 to vector<8x128xf32>
    %38 = arith.mulf %32, %37 : vector<8x128xf32>
    %c0_27 = arith.constant 0 : index
    %c2_28 = arith.constant 2 : index
    %39 = memref.load %arg5[%c0_27, %c2_28] : memref<3x4xf32, #tpu.memory_space<smem>>
    %40 = vector.broadcast %39 : f32 to vector<8x128xf32>
    %41 = arith.mulf %32, %40 : vector<8x128xf32>
    %c0_29 = arith.constant 0 : index
    %c3_30 = arith.constant 3 : index
    %42 = memref.load %arg5[%c0_29, %c3_30] : memref<3x4xf32, #tpu.memory_space<smem>>
    %43 = vector.broadcast %42 : f32 to vector<8x128xf32>
    %44 = arith.mulf %32, %43 : vector<8x128xf32>
    %c0_31 = arith.constant 0 : index
    %c1_32 = arith.constant 1 : index
    %45 = memref.load %arg3[%c0_31, %c1_32] : memref<4x3xf32, #tpu.memory_space<smem>>
    %46 = vector.broadcast %45 : f32 to vector<8x128xf32>
    %47 = arith.mulf %1, %46 : vector<8x128xf32>
    %c1_33 = arith.constant 1 : index
    %c1_34 = arith.constant 1 : index
    %48 = memref.load %arg3[%c1_33, %c1_34] : memref<4x3xf32, #tpu.memory_space<smem>>
    %49 = vector.broadcast %48 : f32 to vector<8x128xf32>
    %50 = arith.mulf %3, %49 : vector<8x128xf32>
    %51 = arith.addf %47, %50 : vector<8x128xf32>
    %c2_35 = arith.constant 2 : index
    %c1_36 = arith.constant 1 : index
    %52 = memref.load %arg3[%c2_35, %c1_36] : memref<4x3xf32, #tpu.memory_space<smem>>
    %53 = vector.broadcast %52 : f32 to vector<8x128xf32>
    %54 = arith.mulf %5, %53 : vector<8x128xf32>
    %55 = arith.addf %51, %54 : vector<8x128xf32>
    %c3_37 = arith.constant 3 : index
    %c1_38 = arith.constant 1 : index
    %56 = memref.load %arg3[%c3_37, %c1_38] : memref<4x3xf32, #tpu.memory_space<smem>>
    %57 = vector.broadcast %56 : f32 to vector<8x128xf32>
    %58 = arith.mulf %7, %57 : vector<8x128xf32>
    %59 = arith.addf %55, %58 : vector<8x128xf32>
    %c1_39 = arith.constant 1 : index
    %60 = memref.load %arg4[%c1_39] : memref<3xf32, #tpu.memory_space<smem>>
    %cst_40 = arith.constant 0.000000e+00 : f32
    %61 = arith.addf %60, %cst_40 : f32
    %62 = vector.broadcast %61 : f32 to vector<8x128xf32>
    %63 = arith.addf %59, %62 : vector<8x128xf32>
    %64 = math.tanh %63 : vector<8x128xf32>
    %cst_41 = arith.constant 2.002000e+00 : f32
    %65 = vector.broadcast %cst_41 : f32 to vector<8x128xf32>
    %66 = arith.mulf %64, %65 : vector<8x128xf32>
    %67 = math.roundeven %66 : vector<8x128xf32>
    %cst_42 = arith.constant 8.000000e+00 : f32
    %68 = vector.broadcast %cst_42 : f32 to vector<8x128xf32>
    %69 = arith.mulf %67, %68 : vector<8x128xf32>
    %70 = arith.addf %32, %69 : vector<8x128xf32>
    %c1_43 = arith.constant 1 : index
    %c0_44 = arith.constant 0 : index
    %71 = memref.load %arg5[%c1_43, %c0_44] : memref<3x4xf32, #tpu.memory_space<smem>>
    %72 = vector.broadcast %71 : f32 to vector<8x128xf32>
    %73 = arith.mulf %67, %72 : vector<8x128xf32>
    %74 = arith.addf %35, %73 : vector<8x128xf32>
    %c1_45 = arith.constant 1 : index
    %c1_46 = arith.constant 1 : index
    %75 = memref.load %arg5[%c1_45, %c1_46] : memref<3x4xf32, #tpu.memory_space<smem>>
    %76 = vector.broadcast %75 : f32 to vector<8x128xf32>
    %77 = arith.mulf %67, %76 : vector<8x128xf32>
    %78 = arith.addf %38, %77 : vector<8x128xf32>
    %c1_47 = arith.constant 1 : index
    %c2_48 = arith.constant 2 : index
    %79 = memref.load %arg5[%c1_47, %c2_48] : memref<3x4xf32, #tpu.memory_space<smem>>
    %80 = vector.broadcast %79 : f32 to vector<8x128xf32>
    %81 = arith.mulf %67, %80 : vector<8x128xf32>
    %82 = arith.addf %41, %81 : vector<8x128xf32>
    %c1_49 = arith.constant 1 : index
    %c3_50 = arith.constant 3 : index
    %83 = memref.load %arg5[%c1_49, %c3_50] : memref<3x4xf32, #tpu.memory_space<smem>>
    %84 = vector.broadcast %83 : f32 to vector<8x128xf32>
    %85 = arith.mulf %67, %84 : vector<8x128xf32>
    %86 = arith.addf %44, %85 : vector<8x128xf32>
    %c0_51 = arith.constant 0 : index
    %c2_52 = arith.constant 2 : index
    %87 = memref.load %arg3[%c0_51, %c2_52] : memref<4x3xf32, #tpu.memory_space<smem>>
    %88 = vector.broadcast %87 : f32 to vector<8x128xf32>
    %89 = arith.mulf %1, %88 : vector<8x128xf32>
    %c1_53 = arith.constant 1 : index
    %c2_54 = arith.constant 2 : index
    %90 = memref.load %arg3[%c1_53, %c2_54] : memref<4x3xf32, #tpu.memory_space<smem>>
    %91 = vector.broadcast %90 : f32 to vector<8x128xf32>
    %92 = arith.mulf %3, %91 : vector<8x128xf32>
    %93 = arith.addf %89, %92 : vector<8x128xf32>
    %c2_55 = arith.constant 2 : index
    %c2_56 = arith.constant 2 : index
    %94 = memref.load %arg3[%c2_55, %c2_56] : memref<4x3xf32, #tpu.memory_space<smem>>
    %95 = vector.broadcast %94 : f32 to vector<8x128xf32>
    %96 = arith.mulf %5, %95 : vector<8x128xf32>
    %97 = arith.addf %93, %96 : vector<8x128xf32>
    %c3_57 = arith.constant 3 : index
    %c2_58 = arith.constant 2 : index
    %98 = memref.load %arg3[%c3_57, %c2_58] : memref<4x3xf32, #tpu.memory_space<smem>>
    %99 = vector.broadcast %98 : f32 to vector<8x128xf32>
    %100 = arith.mulf %7, %99 : vector<8x128xf32>
    %101 = arith.addf %97, %100 : vector<8x128xf32>
    %c2_59 = arith.constant 2 : index
    %102 = memref.load %arg4[%c2_59] : memref<3xf32, #tpu.memory_space<smem>>
    %cst_60 = arith.constant 0.000000e+00 : f32
    %103 = arith.addf %102, %cst_60 : f32
    %104 = vector.broadcast %103 : f32 to vector<8x128xf32>
    %105 = arith.addf %101, %104 : vector<8x128xf32>
    %106 = math.tanh %105 : vector<8x128xf32>
    %cst_61 = arith.constant 2.002000e+00 : f32
    %107 = vector.broadcast %cst_61 : f32 to vector<8x128xf32>
    %108 = arith.mulf %106, %107 : vector<8x128xf32>
    %109 = math.roundeven %108 : vector<8x128xf32>
    %cst_62 = arith.constant 4.000000e+01 : f32
    %110 = vector.broadcast %cst_62 : f32 to vector<8x128xf32>
    %111 = arith.mulf %109, %110 : vector<8x128xf32>
    %112 = arith.addf %70, %111 : vector<8x128xf32>
    %c2_63 = arith.constant 2 : index
    %c0_64 = arith.constant 0 : index
    %113 = memref.load %arg5[%c2_63, %c0_64] : memref<3x4xf32, #tpu.memory_space<smem>>
    %114 = vector.broadcast %113 : f32 to vector<8x128xf32>
    %115 = arith.mulf %109, %114 : vector<8x128xf32>
    %116 = arith.addf %74, %115 : vector<8x128xf32>
    %c2_65 = arith.constant 2 : index
    %c1_66 = arith.constant 1 : index
    %117 = memref.load %arg5[%c2_65, %c1_66] : memref<3x4xf32, #tpu.memory_space<smem>>
    %118 = vector.broadcast %117 : f32 to vector<8x128xf32>
    %119 = arith.mulf %109, %118 : vector<8x128xf32>
    %120 = arith.addf %78, %119 : vector<8x128xf32>
    %c2_67 = arith.constant 2 : index
    %c2_68 = arith.constant 2 : index
    %121 = memref.load %arg5[%c2_67, %c2_68] : memref<3x4xf32, #tpu.memory_space<smem>>
    %122 = vector.broadcast %121 : f32 to vector<8x128xf32>
    %123 = arith.mulf %109, %122 : vector<8x128xf32>
    %124 = arith.addf %82, %123 : vector<8x128xf32>
    %c2_69 = arith.constant 2 : index
    %c3_70 = arith.constant 3 : index
    %125 = memref.load %arg5[%c2_69, %c3_70] : memref<3x4xf32, #tpu.memory_space<smem>>
    %126 = vector.broadcast %125 : f32 to vector<8x128xf32>
    %127 = arith.mulf %109, %126 : vector<8x128xf32>
    %128 = arith.addf %86, %127 : vector<8x128xf32>
    %cst_71 = arith.constant 1.000000e+02 : f32
    %129 = vector.broadcast %cst_71 : f32 to vector<8x128xf32>
    %130 = arith.addf %112, %129 : vector<8x128xf32>
    %131 = arith.fptosi %130 : vector<8x128xf32> to vector<8x128xi32>
    %c0_72 = arith.constant 0 : index
    %c0_73 = arith.constant 0 : index
    %c0_74 = arith.constant 0 : index
    %c0_75 = arith.constant 0 : index
    %132 = vector.load %arg8[%c0_72, %c0_73, %c0_74, %c0_75] : memref<1x1x8x128xi32, #tpu.memory_space<vmem>>, vector<1x1x8x128xi32>
    %133 = vector.shape_cast %132 : vector<1x1x8x128xi32> to vector<8x128xi32>
    %134 = vector.shape_cast %131 : vector<8x128xi32> to vector<1x1x8x128xi32>
    tpu.vector_store %arg8[%c0_72, %c0_73, %c0_74, %c0_75], %134 {strides = array<i32>} : memref<1x1x8x128xi32, #tpu.memory_space<vmem>>, vector<1x1x8x128xi32>,
    %c0_76 = arith.constant 0 : index
    %135 = memref.load %arg6[%c0_76] : memref<4xf32, #tpu.memory_space<smem>>
    %136 = vector.broadcast %135 : f32 to vector<8x128xf32>
    %137 = arith.addf %116, %136 : vector<8x128xf32>
    %c0_77 = arith.constant 0 : index
    %c0_78 = arith.constant 0 : index
    %c0_79 = arith.constant 0 : index
    %c0_80 = arith.constant 0 : index
    %138 = vector.load %arg7[%c0_77, %c0_78, %c0_79, %c0_80] : memref<1x4x8x128xf32, #tpu.memory_space<vmem>>, vector<1x1x8x128xf32>
    %139 = vector.shape_cast %138 : vector<1x1x8x128xf32> to vector<8x128xf32>
    %140 = vector.shape_cast %137 : vector<8x128xf32> to vector<1x1x8x128xf32>
    tpu.vector_store %arg7[%c0_77, %c0_78, %c0_79, %c0_80], %140 {strides = array<i32>} : memref<1x4x8x128xf32, #tpu.memory_space<vmem>>, vector<1x1x8x128xf32>,
    %c1_81 = arith.constant 1 : index
    %141 = memref.load %arg6[%c1_81] : memref<4xf32, #tpu.memory_space<smem>>
    %142 = vector.broadcast %141 : f32 to vector<8x128xf32>
    %143 = arith.addf %120, %142 : vector<8x128xf32>
    %c0_82 = arith.constant 0 : index
    %c1_83 = arith.constant 1 : index
    %c0_84 = arith.constant 0 : index
    %c0_85 = arith.constant 0 : index
    %144 = vector.load %arg7[%c0_82, %c1_83, %c0_84, %c0_85] : memref<1x4x8x128xf32, #tpu.memory_space<vmem>>, vector<1x1x8x128xf32>
    %145 = vector.shape_cast %144 : vector<1x1x8x128xf32> to vector<8x128xf32>
    %146 = vector.shape_cast %143 : vector<8x128xf32> to vector<1x1x8x128xf32>
    tpu.vector_store %arg7[%c0_82, %c1_83, %c0_84, %c0_85], %146 {strides = array<i32>} : memref<1x4x8x128xf32, #tpu.memory_space<vmem>>, vector<1x1x8x128xf32>,
    %c2_86 = arith.constant 2 : index
    %147 = memref.load %arg6[%c2_86] : memref<4xf32, #tpu.memory_space<smem>>
    %148 = vector.broadcast %147 : f32 to vector<8x128xf32>
    %149 = arith.addf %124, %148 : vector<8x128xf32>
    %c0_87 = arith.constant 0 : index
    %c2_88 = arith.constant 2 : index
    %c0_89 = arith.constant 0 : index
    %c0_90 = arith.constant 0 : index
    %150 = vector.load %arg7[%c0_87, %c2_88, %c0_89, %c0_90] : memref<1x4x8x128xf32, #tpu.memory_space<vmem>>, vector<1x1x8x128xf32>
    %151 = vector.shape_cast %150 : vector<1x1x8x128xf32> to vector<8x128xf32>
    %152 = vector.shape_cast %149 : vector<8x128xf32> to vector<1x1x8x128xf32>
    tpu.vector_store %arg7[%c0_87, %c2_88, %c0_89, %c0_90], %152 {strides = array<i32>} : memref<1x4x8x128xf32, #tpu.memory_space<vmem>>, vector<1x1x8x128xf32>,
    %c3_91 = arith.constant 3 : index
    %153 = memref.load %arg6[%c3_91] : memref<4xf32, #tpu.memory_space<smem>>
    %154 = vector.broadcast %153 : f32 to vector<8x128xf32>
    %155 = arith.addf %128, %154 : vector<8x128xf32>
    %c0_92 = arith.constant 0 : index
    %c3_93 = arith.constant 3 : index
    %c0_94 = arith.constant 0 : index
    %c0_95 = arith.constant 0 : index
    %156 = vector.load %arg7[%c0_92, %c3_93, %c0_94, %c0_95] : memref<1x4x8x128xf32, #tpu.memory_space<vmem>>, vector<1x1x8x128xf32>
    %157 = vector.shape_cast %156 : vector<1x1x8x128xf32> to vector<8x128xf32>
    %158 = vector.shape_cast %155 : vector<8x128xf32> to vector<1x1x8x128xf32>
    tpu.vector_store %arg7[%c0_92, %c3_93, %c0_94, %c0_95], %158 {strides = array<i32>} : memref<1x4x8x128xf32, #tpu.memory_space<vmem>>, vector<1x1x8x128xf32>,
    return
  }
  func.func @transform_0(%arg0: i32, %arg1: i32) -> (i32, i32, i32, i32) {
    %c0_i32 = arith.constant 0 : i32
    %c0_i32_0 = arith.constant 0 : i32
    %c0_i32_1 = arith.constant 0 : i32
    return %arg0, %c0_i32, %arg1, %c0_i32_0 : i32, i32, i32, i32
  }
  func.func @transform_1(%arg0: i32, %arg1: i32) -> (i32, i32) {
    %c0_i32 = arith.constant 0 : i32
    %c0_i32_0 = arith.constant 0 : i32
    %c0_i32_1 = arith.constant 0 : i32
    return %c0_i32, %c0_i32_0 : i32, i32
  }
  func.func @transform_2(%arg0: i32, %arg1: i32) -> i32 {
    %c0_i32 = arith.constant 0 : i32
    %c0_i32_0 = arith.constant 0 : i32
    return %c0_i32 : i32
  }
  func.func @transform_3(%arg0: i32, %arg1: i32) -> (i32, i32) {
    %c0_i32 = arith.constant 0 : i32
    %c0_i32_0 = arith.constant 0 : i32
    %c0_i32_1 = arith.constant 0 : i32
    return %c0_i32, %c0_i32_0 : i32, i32
  }
  func.func @transform_4(%arg0: i32, %arg1: i32) -> i32 {
    %c0_i32 = arith.constant 0 : i32
    %c0_i32_0 = arith.constant 0 : i32
    return %c0_i32 : i32
  }
  func.func @transform_5(%arg0: i32, %arg1: i32) -> (i32, i32, i32, i32) {
    %c0_i32 = arith.constant 0 : i32
    %c0_i32_0 = arith.constant 0 : i32
    %c0_i32_1 = arith.constant 0 : i32
    return %arg0, %c0_i32, %arg1, %c0_i32_0 : i32, i32, i32, i32
  }
  func.func @transform_6(%arg0: i32, %arg1: i32) -> (i32, i32, i32, i32) {
    %c0_i32 = arith.constant 0 : i32
    %c0_i32_0 = arith.constant 0 : i32
    %c0_i32_1 = arith.constant 0 : i32
    return %arg0, %c0_i32, %arg1, %c0_i32_0 : i32, i32, i32, i32
  }
}

</mosaic_0001>

<bundles_post_ra>
// kernel: tpu_custom_call.1
= control target key start
LH: loop header
LB: loop body
LE: loop exit
PB: predicated region body
PF: predicated region fallthrough
CT: control target
= control target key end

     0   :  { %s1493_s0 = inlined_call_operand.hbm [shape: f32[2,4,8,128], index: 0, kind: input, shape index: {}]   ;;  %s1494_s1 = inlined_call_operand.hbm [shape: f32[4,3], index: 1, kind: input, shape index: {}]   ;;  %s1495_s2 = inlined_call_operand.vmem [shape: f32[3], index: 2, kind: input, shape index: {}]   ;;  %s1496_s3 = inlined_call_operand.vmem [shape: f32[3,4], index: 3, kind: input, shape index: {}]   ;;  %s1497_s4 = inlined_call_operand.vmem [shape: f32[4], index: 4, kind: input, shape index: {}]   ;;  %s1498_s5 = inlined_call_operand.hbm [shape: f32[2,4,8,128], index: 5, kind: output, shape index: {0}]   ;;  %s1499_s6 = inlined_call_operand.hbm [shape: s32[2,1,8,128], index: 6, kind: output, shape index: {1}]  }
   0x1   :  { %1505 = sst [smem:[#allocation21_spill]] %s1493_s0 }
   0x2   :  { %1506 = sst [smem:[#allocation22_spill]] %s1494_s1 }
   0x3   :  { %1507 = sst [smem:[#allocation23_spill]] %s1495_s2 }
   0x4   :  { %12 = vsyncpa [#allocation3], 0 }
   0x5   :  { %14 = vsyncpa [#allocation3 + $0x1], 0 }
   0x6   :  { %15 = vsyncpa [#allocation5], 0 }
   0x7   :  { %16 = vsyncpa [#allocation6], 0 }
   0x8   :  { %17 = vsyncpa [#allocation10], 0 }
   0x9   :  { %18 = vsyncpa [#allocation4], 0 }
   0xa   :  { %20 = vsyncpa [#allocation4 + $0x1], 0 }
   0xb   :  { %21 = vsyncpa [#allocation14], 0 }
   0xc   :  { %23 = vsyncpa [#allocation14 + $0x1], 0  ;;  %s1136_s21 = smov 0   ;;  %s1138_s22 = smov 0  }
   0xd   :  { %s1140_s23 = smov 0   ;;  %s1142_s24 = smov 0  }
   0xe   :  { %s1144_s25 = smov 0   ;;  %s1146_s26 = smov 0  }
   0xf LB: > { %s689_s27 = sadd.s32 4294967295, %s1088_s26   ;;  %s690_s28 = sadd.s32 4294967294, %s1088_s26   ;;  %s1088_s26 = sphi %s1146_s26, %s29_s26   ;;  %s1084_s25 = sphi %s1144_s25, %s1529_s25   ;;  %s1080_s24 = sphi %s1142_s24, %s1528_s24   ;;  %s1076_s23 = sphi %s1140_s23, %s1527_s23   ;;  %s1072_s22 = sphi %s1138_s22, %s1526_s22   ;;  %s1068_s21 = sphi %s1136_s21, %s1525_s21  }
  0x10   : > { %p63_p0 = scmp.ne.s32.totalorder %s1072_s22, %s1068_s21  ;;  %p1170_p1 = scmp.eq.s32.totalorder %s689_s27, 0 }
  0x11   : > { %p1174_p2 = scmp.eq.s32.totalorder %s689_s27, 1  ;;  %p179_p3 = scmp.eq.s32.totalorder %s690_s28, 1 }
  0x12   : > { %s1508_s29 = scalar_select %p1170_p1, 1, 0 }
  0x13   : > { %p1180_p4 = por %p1170_p1, %p63_p0  ;;  %p691_p5 = scmp.ge.s32.totalorder %s1088_s26, 1 }
  0x14   : > { %p1185_p6 = por %p179_p3, %p63_p0  ;;  %p214_p7 = scmp.lt.s32.totalorder %s1088_s26, 3 }
  0x15   : > { %s1510_s7 = scalar_select %p1180_p4, 1, 0 }
  0x16   : > { %s1511_s8 = scalar_select %p1185_p6, 1, 0 }
  0x17   : > { %s247_s11 = sshll.u32 %s1496_s3, 4  ;;  %p1193_p8 = pnand %p691_p5, %p214_p7  ;;  %s248_s11 = int_to_ptr.vmem [resolvable:$true] %s247_s11 }
  0x18   : > { %s1514_s2 = sld [smem:[#allocation23_spill]]  ;;  %s258_s19 = sshll.u32 %s1497_s4, 4  ;;  %s259_s19 = int_to_ptr.vmem [resolvable:$true] %s258_s19 }
  0x19   : > { %p778_p10 = pneg %p1193_p8  ;;  %s874_s20 = scalar_lea.vmem %s248_s11, 64 }
  0x1a   : > { %p875_p12 = scmp.ne.s32.totalorder %s248_s11, %s874_s20  ;;  %p882_p5 = scmp.lt.s32.totalorder %s248_s11, %s248_s11 }
  0x1b   : > { %p1202_p11 = pnand %p778_p10, %p1170_p1  ;;  %p883_p7 = scmp.lt.s32.totalorder %s874_s20, %s874_s20 }
  0x1d   : > { %p876_p13 = pneg %p1202_p11  ;;  %p884_p10 = por %p883_p7, %p882_p5 }
  0x1e   : > { %s236_s16 = sshll.u32 %s1514_s2, 4  ;;  %s1209_s16 = int_to_ptr.vmem [resolvable:$true] %s236_s16 }
  0x1f   : > { %p877_p0 = pnand %p876_p13, %p875_p12 }
  0x21   : > { %p878_p3 = pneg %p877_p0 }
  0x23   : > { %p885_p9 = pnand %p884_p10, %p878_p3 }
  0x25   : > { %888 = shalt.err (!%p885_p9)
}
  0x26   : > { %s1090_s27 = smov [#allocation9]   ;;  %s1515_s1 = sld [smem:[#allocation22_spill]] }
  0x27   : > { %787 = dma.vmem_to_smem (!%p1202_p11), %s248_s11, 64, %s1090_s27, [#allocation10]  }
  0x2c   : > { %s889_s10 = scalar_lea.hbm %s1515_s1, 64 }
  0x2d   : > { %p890_p6 = scmp.ne.s32.totalorder %s1515_s1, %s889_s10  ;;  %p896_p9 = scmp.lt.u32.totalorder %s889_s10, %s1515_s1 }
  0x2f   : > { %p892_p12 = pnand %p890_p6, %p876_p13 }
  0x31   : > { %p893_p0 = pneg %p892_p12 }
  0x33   : > { %p898_p3 = pnand %p896_p9, %p893_p0 }
  0x35   : > { %901 = shalt.err (!%p898_p3)
}
  0x36   : > { %s1091_s20 = smov [#allocation7]   ;;  %s902_s28 = scalar_lea.vmem %s1209_s16, 16 }
  0x37   : > { %781 = dma.hbm_to_smem (!%p1202_p11), %s1515_s1, 64, %s1091_s20, [#allocation5]  }
  0x38   : > { %p903_p6 = scmp.ne.s32.totalorder %s1209_s16, %s902_s28  ;;  %p910_p10 = scmp.lt.s32.totalorder %s1209_s16, %s1209_s16 }
  0x39   : > { %p911_p12 = scmp.lt.s32.totalorder %s902_s28, %s902_s28 }
  0x3a   : > { %p905_p5 = pnand %p903_p6, %p876_p13 }
  0x3b   : > { %p912_p0 = por %p911_p12, %p910_p10 }
  0x3c   : > { %p906_p7 = pneg %p905_p5 }
  0x3e   : > { %p913_p9 = pnand %p912_p0, %p906_p7 }
  0x40   : > { %916 = shalt.err (!%p913_p9)
}
  0x41   : > { %s1092_s9 = smov [#allocation8]   ;;  %s917_s15 = scalar_lea.vmem %s259_s19, 16 }
  0x42   : > { %784 = dma.vmem_to_smem (!%p1202_p11), %s1209_s16, 16, %s1092_s9, [#allocation6]  }
  0x43   : > { %p918_p3 = scmp.ne.s32.totalorder %s259_s19, %s917_s15  ;;  %p925_p10 = scmp.lt.s32.totalorder %s259_s19, %s259_s19 }
  0x44   : > { %p926_p7 = scmp.lt.s32.totalorder %s917_s15, %s917_s15 }
  0x45   : > { %p920_p6 = pnand %p918_p3, %p876_p13 }
  0x46   : > { %p927_p12 = por %p926_p7, %p925_p10 }
  0x47   : > { %p921_p5 = pneg %p920_p6 }
  0x49   : > { %p928_p0 = pnand %p927_p12, %p921_p5 }
  0x4b   : > { %931 = shalt.err (!%p928_p0)
}
  0x4c   : > { %s1093_s17 = smov [#allocation11]   ;;  %s41_s16 = sadd.s32 1, %s1084_s25 }
  0x4d   : > { %790 = dma.vmem_to_smem (!%p1202_p11), %s259_s19, 16, %s1093_s17, [#allocation10]  }
  0x4e   : > { %s50_s18 = sadd.s32 1, %s1076_s23  ;;  %p43_p13 = scmp.ge.s32.totalorder %s41_s16, 2 }
  0x4f   : > { %p57_p9 = scmp.ne.s32.totalorder %s1076_s23, %s1072_s22  ;;  %p58_p3 = scmp.eq.s32.totalorder %s1088_s26, 0 }
  0x50   : > { %p806_p6 = scmp.lt.s32.totalorder %s1088_s26, 2  ;;  %s1531_s16 = smov (%p43_p13, %s41_s16), 0 }
  0x51   : > { %p59_p5 = por %p58_p3, %p57_p9  ;;  %p1267_p10 = por %p1174_p2, %p57_p9 }
  0x52   : > { %s45_s20 = ssub.s32 %s1084_s25, %s1531_s16  ;;  %s269_s11 = sand.u32 1, %s1076_s23  }
  0x53   : > { %s1516_s13 = scalar_select %p1267_p10, 1, 0 }
  0x54   : > { %p48_p7 = scmp.eq.s32.totalorder %s45_s20, 0  ;;  %s697_s19 = sshll.u32 %s269_s11, 5 }
  0x55   : > { %s749_s27 = sshll.u32 %s1084_s25, 9  ;;  %s1517_s0 = sld [smem:[#allocation21_spill]] }
  0x56   : > { %s1276_s28 = scalar_select %p48_p7, %s1076_s23, %s50_s18  }
  0x57   : > { %s273_s30 = scalar_lea.vmem [#allocation2], %s697_s19  ;;  %p1285_p2 = pnand %p806_p6, %p59_p5 }
  0x58   : > { %s281_s15 = sshll.u32 %s273_s30, 4  ;;  %s1291_s18 = scalar_lea.sflag [#allocation3], %s269_s11  ;;  %s1289_s15 = int_to_ptr.vmem [resolvable:$true] %s281_s15 }
  0x59   : > { %p934_p12 = pneg %p1285_p2 }
  0x5b   : > { %s1281_s14 = scalar_lea.hbm %s1517_s0, %s749_s27  ;;  %s937_s9 = scalar_lea.hbm %s1517_s0, 1024 }
  0x5c   : > { %s932_s20 = scalar_lea.hbm %s1281_s14, 512  ;;  %p938_p9 = scmp.lt.u32.totalorder %s1281_s14, %s1517_s0 }
  0x5d   : > { %p933_p11 = scmp.ne.s32.totalorder %s1281_s14, %s932_s20  ;;  %p939_p3 = scmp.lt.u32.totalorder %s937_s9, %s932_s20 }
  0x5e   : > { %p941_p5 = scmp.lt.u32.totalorder %s932_s20, %s1281_s14 }
  0x5f   : > { %p935_p0 = pnand %p934_p12, %p933_p11  ;;  %p940_p6 = por %p939_p3, %p938_p9 }
  0x61   : > { %p936_p13 = pneg %p935_p0  ;;  %p942_p7 = por %p941_p5, %p940_p6 }
  0x63   : > { %p943_p10 = pnand %p942_p7, %p936_p13 }
  0x65   : > { %946 = shalt.err (!%p943_p10)
}
  0x66   : > { %s947_s11 = scalar_lea.vmem %s1289_s15, 512  ;;  %s1094_s19 = smov [#allocation2]  }
  0x67   : > { %p948_p11 = scmp.ne.s32.totalorder %s1289_s15, %s947_s11  ;;  %s952_s27 = sshll.u32 %s1094_s19, 4  ;;  %s953_s27 = int_to_ptr.vmem [resolvable:$false] %s952_s27 }
  0x68   : > { %s954_s10 = scalar_lea.vmem %s953_s27, 1024  ;;  %p955_p4 = scmp.lt.s32.totalorder %s1289_s15, %s953_s27 }
  0x69   : > { %p950_p0 = pnand %p948_p11, %p934_p12  ;;  %p956_p9 = scmp.lt.s32.totalorder %s954_s10, %s947_s11 }
  0x6b   : > { %p951_p1 = pneg %p950_p0  ;;  %p957_p3 = por %p956_p9, %p955_p4 }
  0x6d   : > { %p958_p6 = pnand %p957_p3, %p951_p1 }
  0x6f   : > { %961 = shalt.err (!%p958_p6)
}
  0x70   : > { %s1095_s20 = smov 128   ;;  %s1096_s9 = smov 8  }
  0x71   : > { %794 = dma.hbm_to_vmem [thread:$0]  (!%p1285_p2), %s1281_s14, 512, %s1289_s15, %s1291_s18, %s1095_s20, %s1095_s20, %s1096_s9  }
  0x72   : > { %293 = sbr.rel (%p1193_p8) target bundleno = 214 (0xd6), region = 40  ;;  %s1322_s30 = sand.u32 (!%p1193_p8), 1, %s1072_s22  }
  0x73   : > { %s1504_s11 = sshll.u32 (!%p1193_p8), %s1322_s30, 5  ;;  %s296_s19 = scalar_lea.sflag (!%p1193_p8), [#allocation3], %s1322_s30 }
  0x74   : > { %s299_s27 = scalar_lea.vmem (!%p1193_p8), [#allocation2], %s1504_s11  ;;  %p1519_p1 = scmp.ne.s32.totalorder (!%p1193_p8), %s1510_s7, 0 }
  0x79   : > { %1043 = dma.done.wait (%p1519_p1), %s296_s19, 512  }
  0x7a   : > { %1045 = vsyncadd (%p1519_p1), %s296_s19, 4294966784  ;;  %p1520_p4 = scmp.ne.s32.totalorder %s1508_s29, 0 }
  0x7c   : > { %1047 = dma.done.wait (%p1520_p4), [#allocation5], 64  }
  0x7d   : > { %1049 = vsyncadd (%p1520_p4), [#allocation5], 4294967232 }
  0x7e   : > { %1051 = dma.done.wait (%p1520_p4), [#allocation6], 16  }
  0x7f   : > { %1053 = vsyncadd (%p1520_p4), [#allocation6], 4294967280 }
  0x80   : > { %1055 = dma.done.wait (%p1520_p4), [#allocation10], 80  }
  0x81   : > { %1057 = vsyncadd (%p1520_p4), [#allocation10], 4294967216 }
  0x82   : > { %320 = sfence }
  0x83   : > { %s357_s7 = sld [smem:[#allocation7]]  ;;  %s718_s18 = sld [smem:[#allocation7 + $0x1]]  ;;  %v350_v0 = vld [vmem:[%s299_s27] sm:$0xff]  ;;  %v708_v1 = vld [vmem:[%s299_s27 + $0x8] sm:$0xff]  ;;  %v709_v2 = vld [vmem:[%s299_s27 + $0x10] sm:$0xff] }
  0x84   : > { %s711_s12 = sld [smem:[#allocation7 + $0x80]]  ;;  %s719_s10 = sld [smem:[#allocation7 + $0x81]]  ;;  %v710_v3 = vld [vmem:[%s299_s27 + $0x18] sm:$0xff] }
  0x85   : > { %s712_s14 = sld [smem:[#allocation7 + $0x100]]  ;;  %s720_s20 = sld [smem:[#allocation7 + $0x101]] }
  0x86   : > { %s713_s15 = sld [smem:[#allocation7 + $0x180]]  ;;  %s721_s9 = sld [smem:[#allocation7 + $0x181]] }
  0x87   : > { %s1344_s17 = sld [smem:[#allocation8]]  ;;  %s727_s19 = sld [smem:[#allocation7 + $0x2]] }
  0x88   : > { %s728_s29 = sld [smem:[#allocation7 + $0x82]]  ;;  %s1348_s1 = sld [smem:[#allocation8 + $0x1]] }
  0x89   : > { %v358_v4 = vstv %s357_s7  ;;  %s729_s11 = sld [smem:[#allocation7 + $0x102]]  ;;  %v393_v12 = vstv %s718_s18  ;;  %s1355_s7 = sld [smem:[#allocation9 + $0x80]] }
  0x8a   : > { %v359_v5 = vmul.f32 %v358_v4, %v350_v0  ;;  %v361_v6 = vstv %s711_s12  ;;  %s1346_s0 = sld [smem:[#allocation7 + $0x182]]  ;;  %v394_v14 = vmul.f32 %v393_v12, %v350_v0  ;;  %v396_v15 = vstv %s719_s10  ;;  %s1363_s12 = sld [smem:[#allocation9 + $0x81]] }
  0x8b   : > { %v362_v7 = vmul.f32 %v708_v1, %v361_v6  ;;  %v365_v8 = vstv %s712_s14  ;;  %v400_v16 = vstv %s720_s20  ;;  %v397_v17 = vmul.f32 %v708_v1, %v396_v15  ;;  %s731_s27 = sld [smem:[#allocation8 + $0x2]]  ;;  %s1365_s14 = sld [smem:[#allocation9 + $0x101]] }
  0x8c   : > { %v369_v9 = vstv %s713_s15  ;;  %v366_v10 = vmul.f32 %v709_v2, %v365_v8  ;;  %v401_v18 = vmul.f32 %v709_v2, %v400_v16  ;;  %v404_v19 = vstv %s721_s9  ;;  %s1367_s15 = sld [smem:[#allocation11 + $0x1]]  ;;  %s1371_s18 = sld [smem:[#allocation9 + $0x82]] }
  0x8d   : > { %v370_v11 = vmul.f32 %v710_v3, %v369_v9  ;;  %s373_s2 = sadd.f32 0.14369535, %s1344_s17  ;;  %v363_v13 = vadd.f32 %v362_v7, %v359_v5  ;;  %v405_v22 = vmul.f32 %v710_v3, %v404_v19  ;;  %v433_v23 = vstv %s727_s19  ;;  %s1369_s17 = sld [smem:[#allocation9 + $0x2]] }
  0x8e   : > { %v398_v24 = vadd.f32 %v397_v17, %v394_v14  ;;  %v434_v25 = vmul.f32 %v433_v23, %v350_v0  ;;  %v436_v26 = vstv %s728_s29  ;;  %v409_v34 = vstv %s1348_s1  ;;  %s1361_s1 = sld [smem:[#allocation9 + $0x1]]  ;;  %s1373_s10 = sld [smem:[#allocation9 + $0x102]] }
  0x8f   : > { %v367_v20 = vadd.f32 %v366_v10, %v363_v13  ;;  %v374_v21 = vstv %s373_s2  ;;  %v440_v27 = vstv %s729_s11  ;;  %v437_v29 = vmul.f32 %v708_v1, %v436_v26  ;;  %s1353_s2 = sld [smem:[#allocation9]]  ;;  %s1375_s20 = sld [smem:[#allocation9 + $0x3]] }
  0x90   : > { %v441_v30 = vmul.f32 %v709_v2, %v440_v27  ;;  %v444_v31 = vstv %s1346_s0  ;;  %v402_v32 = vadd.f32 %v401_v18, %v398_v24  ;;  %s1357_s11 = sld [smem:[#allocation9 + $0x100]]  ;;  %s1377_s9 = sld [smem:[#allocation9 + $0x83]]  ;;  %v417_v48 = vstv %s1355_s7 }
  0x91   : > { %v371_v28 = vadd.f32 %v370_v11, %v367_v20  ;;  %v438_v35 = vadd.f32 %v437_v29, %v434_v25  ;;  %v445_v36 = vmul.f32 %v710_v3, %v444_v31  ;;  %v449_v40 = vstv %s731_s27  ;;  %s1359_s0 = sld [smem:[#allocation11]]  ;;  %s1379_s19 = sld [smem:[#allocation9 + $0x103]] }
  0x92   : > { %v406_v37 = vadd.f32 %v405_v22, %v402_v32  ;;  %v421_v53 = vstv %s1363_s12  ;;  %s1388_s29 = sld [smem:[#allocation11 + $0x2]]  ;;  %s1390_s27 = sld [smem:[#allocation11 + $0x3]]  ;;  %v461_v56 = vstv %s1365_s14  ;;  %v480_v57 = vstv %s1367_s15 }
  0x93   : > { %v375_v33 = vadd.f32 %v374_v21, %v371_v28  ;;  %v442_v38 = vadd.f32 %v441_v30, %v438_v35  ;;  %v387_v54 = vstv %s1369_s17  ;;  %v425_v58 = vstv %s1371_s18  ;;  %s1521_s7 = sshll.u32 %s1322_s30, 5  ;;  %s750_s14 = sshll.u32 %s1080_s24, 9 }
  0x94   : > { %v410_v39 = vadd.f32 %v409_v34, %v406_v37  ;;  %v384_v52 = vstv %s1361_s1  ;;  %v465_v61 = vstv %s1373_s10  ;;  %s746_s15 = sshll.u32 %s1080_s24, 7  ;;  %s1414_s10 = scalar_lea.hbm %s1498_s5, %s750_s14 }
  0x95   : > { %868 = vtanh.f32 %v375_v33  ;;  %v446_v41 = vadd.f32 %v445_v36, %v442_v38  ;;  %v381_v45 = vstv %s1353_s2  ;;  %v390_v62 = vstv %s1375_s20  ;;  %s707_s2 = sshll.u32 %s1322_s30, 3  ;;  %s495_s24 = scalar_lea.sflag [#allocation4], %s1322_s30 }
  0x96   : > { %870 = vtanh.f32 %v410_v39  ;;  %v457_v49 = vstv %s1357_s11  ;;  %v429_v63 = vstv %s1377_s9  ;;  %s342_s11 = scalar_lea.vmem [#allocation12], %s1521_s7  ;;  %s1404_s1 = scalar_lea.vmem [#allocation13], %s707_s2 }
  0x97   : > { %v450_v42 = vadd.f32 %v449_v40, %v446_v41  ;;  %v476_v50 = vstv %s1359_s0  ;;  %v469_v11 = vstv %s1379_s19  ;;  %s514_s0 = sshll.u32 %s342_s11, 4  ;;  %s531_s12 = sshll.u32 %s1404_s1, 4  ;;  %s1408_s0 = int_to_ptr.vmem [resolvable:$true] %s514_s0  ;;  %s1416_s12 = int_to_ptr.vmem [resolvable:$true] %s531_s12 }
  0x98   : > { %v485_v20 = vstv %s1388_s29  ;;  %v490_v23 = vstv %s1390_s27  ;;  %s1421_s19 = scalar_lea.hbm %s1499_s6, %s746_s15  ;;  %s962_s29 = scalar_lea.vmem %s1408_s0, 512 }
  0x99   : > { %872 = vtanh.f32 %v450_v42  ;;  %p963_p8 = scmp.ne.s32.totalorder %s1408_s0, %s962_s29  ;;  %p1522_p10 = scmp.ne.s32.totalorder %s1516_s13, 0 }
  0x9a   : > { %s1097_s27 = smov [#allocation12]  }
  0x9b   : > { %p964_p2 = pnand %p963_p8, %p1522_p10  ;;  %s966_s2 = sshll.u32 %s1097_s27, 4  ;;  %s967_s2 = int_to_ptr.vmem [resolvable:$false] %s966_s2 }
  0x9c   : > { %s968_s7 = scalar_lea.vmem %s967_s2, 1024  ;;  %p969_p13 = scmp.lt.s32.totalorder %s1408_s0, %s967_s2 }
  0x9d   : > { %p965_p12 = pneg %p964_p2  ;;  %p970_p5 = scmp.lt.s32.totalorder %s968_s7, %s962_s29 }
  0x9f   : > { %v869_v43 = vpop.eup %868  ;;  %p971_p7 = por %p970_p5, %p969_p13 }
  0xa0   : > { %v377_v44 = vmul.f32 3.5035002, %v869_v43  ;;  %v871_v46 = vpop.eup %870 }
  0xa1   : > { %v412_v51 = vmul.f32 2.002, %v871_v46  ;;  %p972_p11 = pnand %p971_p7, %p965_p12 }
  0xa2   : > { %v714_v47 = vadd.f32 -0.5, %v377_v44 }
  0xa3   : > { %v873_v59 = vpop.eup %872  ;;  %v752_v60 = vround.rtne.f32 %v412_v51 }
  0xa4   : > { %v751_v55 = vround.rtne.f32 %v714_v47  ;;  %v452_v0 = vmul.f32 2.002, %v873_v59 }
  0xa5   : > { %v414_v4 = vmul.f32 8.0, %v752_v60  ;;  %v418_v5 = vmul.f32 %v752_v60, %v417_v48  ;;  %v422_v6 = vmul.f32 %v752_v60, %v421_v53  ;;  %v426_v7 = vmul.f32 %v752_v60, %v425_v58 }
  0xa6   : > { %v382_v1 = vmul.f32 %v751_v55, %v381_v45  ;;  %v385_v2 = vmul.f32 %v751_v55, %v384_v52  ;;  %v388_v3 = vmul.f32 %v751_v55, %v387_v54  ;;  %v753_v8 = vround.rtne.f32 %v452_v0 }
  0xa7   : > { %v391_v9 = vmul.f32 %v751_v55, %v390_v62  ;;  %v430_v10 = vmul.f32 %v752_v60, %v429_v63  ;;  %v415_v12 = vadd.f32 %v751_v55, %v414_v4 }
  0xa8   : > { %v419_v13 = vadd.f32 %v418_v5, %v382_v1  ;;  %v423_v14 = vadd.f32 %v422_v6, %v385_v2  ;;  %v427_v15 = vadd.f32 %v426_v7, %v388_v3  ;;  %v454_v16 = vmul.f32 40.0, %v753_v8 }
  0xa9   : > { %v458_v17 = vmul.f32 %v753_v8, %v457_v49  ;;  %v462_v18 = vmul.f32 %v753_v8, %v461_v56  ;;  %v466_v19 = vmul.f32 %v753_v8, %v465_v61  ;;  %v431_v21 = vadd.f32 %v430_v10, %v391_v9 }
  0xaa   : > { %v470_v22 = vmul.f32 %v753_v8, %v469_v11  ;;  %v455_v24 = vadd.f32 %v454_v16, %v415_v12 }
  0xab   : > { %v459_v25 = vadd.f32 %v458_v17, %v419_v13  ;;  %v463_v26 = vadd.f32 %v462_v18, %v423_v14  ;;  %v467_v27 = vadd.f32 %v466_v19, %v427_v15 }
  0xac   : > { %v471_v28 = vadd.f32 %v470_v22, %v431_v21  ;;  %v472_v29 = vadd.f32 100.0, %v455_v24 }
  0xad   : > { %v477_v30 = vadd.f32 %v476_v50, %v459_v25  ;;  %v481_v31 = vadd.f32 %v480_v57, %v463_v26  ;;  %v486_v32 = vadd.f32 %v485_v20, %v467_v27 }
  0xae   : > { %v491_v33 = vadd.f32 %v490_v23, %v471_v28  ;;  %v754_v34 = vtrunc.f32 %v472_v29 }
  0xaf   : > { %478 = vst [vmem:[%s342_s11] sm:$0xff] %v477_v30  ;;  %737 = vst [vmem:[%s342_s11 + $0x8] sm:$0xff] %v481_v31 }
  0xb0   : > { %739 = vst [vmem:[%s342_s11 + $0x10] sm:$0xff] %v486_v32  ;;  %741 = vst [vmem:[%s342_s11 + $0x18] sm:$0xff] %v491_v33  ;;  %v755_v35 = vcvt.f32.s32 %v754_v34 }
  0xb1   : > { %975 = shalt.err (!%p972_p11)
}
  0xb2   : > { %s976_s11 = scalar_lea.hbm %s1414_s10, 512  ;;  %s980_s17 = scalar_lea.hbm %s1498_s5, 1024 }
  0xb3   : > { %p977_p0 = scmp.ne.s32.totalorder %s1414_s10, %s976_s11  ;;  %p981_p6 = scmp.lt.u32.totalorder %s1414_s10, %s1498_s5 }
  0xb4   : > { %p982_p1 = scmp.lt.u32.totalorder %s980_s17, %s976_s11  ;;  %p984_p8 = scmp.lt.u32.totalorder %s976_s11, %s1414_s10 }
  0xb5   : > { %p978_p9 = pnand %p977_p0, %p1522_p10 }
  0xb6   : > { %p983_p4 = por %p982_p1, %p981_p6 }
  0xb7   : > { %p979_p3 = pneg %p978_p9 }
  0xb8   : > { %p985_p2 = por %p984_p8, %p983_p4 }
  0xba   : > { %p986_p12 = pnand %p985_p2, %p979_p3 }
  0xbc   : > { %989 = shalt.err (!%p986_p12)
}
  0xbd   : > { %s1098_s9 = smov 128   ;;  %s1099_s29 = smov 8   ;;  %474 = vst [vmem:[%s1404_s1] sm:$0xff] %v755_v35 }
  0xbe   : > { %774 = dma.vmem_to_hbm [thread:$0]  (%p1522_p10), %s1408_s0, 512, %s1414_s10, %s495_s24, %s1098_s9, %s1098_s9, %s1099_s29  }
  0xbf   : > { %s500_s27 = scalar_lea.sflag [#allocation14], %s1322_s30  ;;  %s990_s2 = scalar_lea.vmem %s1416_s12, 128 }
  0xc0   : > { %p991_p13 = scmp.ne.s32.totalorder %s1416_s12, %s990_s2  ;;  %s1100_s7 = smov [#allocation13]  }
  0xc1   : > { %s994_s11 = sshll.u32 %s1100_s7, 4  ;;  %s995_s11 = int_to_ptr.vmem [resolvable:$false] %s994_s11 }
  0xc2   : > { %p992_p5 = pnand %p991_p13, %p1522_p10  ;;  %s996_s14 = scalar_lea.vmem %s995_s11, 256 }
  0xc3   : > { %p997_p11 = scmp.lt.s32.totalorder %s1416_s12, %s995_s11  ;;  %p998_p0 = scmp.lt.s32.totalorder %s996_s14, %s990_s2 }
  0xc4   : > { %p993_p7 = pneg %p992_p5 }
  0xc5   : > { %p999_p9 = por %p998_p0, %p997_p11 }
  0xc7   : > { %p1000_p3 = pnand %p999_p9, %p993_p7 }
  0xc9   : > { %1003 = shalt.err (!%p1000_p3)
}
  0xca   : > { %s1004_s30 = scalar_lea.hbm %s1421_s19, 128  ;;  %s1008_s10 = scalar_lea.hbm %s1499_s6, 256 }
  0xcb   : > { %p1005_p6 = scmp.ne.s32.totalorder %s1421_s19, %s1004_s30  ;;  %p1009_p8 = scmp.lt.u32.totalorder %s1421_s19, %s1499_s6 }
  0xcc   : > { %p1010_p2 = scmp.lt.u32.totalorder %s1008_s10, %s1004_s30  ;;  %p1012_p13 = scmp.lt.u32.totalorder %s1004_s30, %s1421_s19 }
  0xcd   : > { %p1006_p1 = pnand %p1005_p6, %p1522_p10 }
  0xce   : > { %p1011_p12 = por %p1010_p2, %p1009_p8 }
  0xcf   : > { %p1007_p4 = pneg %p1006_p1 }
  0xd0   : > { %p1013_p5 = por %p1012_p13, %p1011_p12 }
  0xd2   : > { %p1014_p7 = pnand %p1013_p5, %p1007_p4 }
  0xd4   : > { %1017 = shalt.err (!%p1014_p7)
}
  0xd5   : > { %775 = dma.vmem_to_hbm [thread:$0]  (%p1522_p10), %s1416_s12, 128, %s1421_s19, %s500_s27  }
  0xd6 PF: > { %s543_s17 = sand.u32 1, %s1068_s21   ;;  %p1523_p11 = scmp.ne.s32.totalorder %s1511_s8, 0 }
  0xd7   : > { %p1524_p0 = scmp.ge.s32.totalorder %s1088_s26, 2  ;;  %s544_s18 = scalar_lea.sflag [#allocation4], %s543_s17 }
  0xd9   : > { %p796_p9 = pnand %p1524_p0, %p1523_p11 }
  0xdb   : > { %1059 = dma.done.wait (!%p796_p9), %s544_s18, 512  }
  0xdc   : > { %1061 = vsyncadd (!%p796_p9), %s544_s18, 4294966784  ;;  %s553_s20 = scalar_lea.sflag [#allocation14], %s543_s17 }
  0xdd   : > { %1063 = dma.done.wait (!%p796_p9), %s553_s20, 128  }
  0xde   : > { %1065 = vsyncadd (!%p796_p9), %s553_s20, 4294967168  ;;  %s29_s26 = sadd.s32 1, %s1088_s26   ;;  %s1525_s21 = smov %s1072_s22 }
  0xdf   : > { %p26_p3 = scmp.ge.s32.totalorder %s29_s26, 4   ;;  %s1526_s22 = smov %s1076_s23 }
  0xe0   : > { %s1527_s23 = smov %s1276_s28  ;;  %s1528_s24 = smov %s1084_s25 }
  0xe1   : > { %s1529_s25 = smov %s1531_s16  ;;  %28 = sbr.rel (!%p26_p3) target bundleno = 15 (0xf), region = 126 }
  0xe8   :  { %558 = vsyncpa [#allocation3], 1 }
  0xe9   :  { %560 = vsyncpa [#allocation3 + $0x1], 1 }
  0xea   :  { %561 = vsyncpa [#allocation4], 1 }
  0xeb   :  { %563 = vsyncpa [#allocation4 + $0x1], 1 }
  0xec   :  { %564 = vsyncpa [#allocation14], 1 }
  0xed   :  { %566 = vsyncpa [#allocation14 + $0x1], 1 }
  0xee   :  { %567 = vsyncpa [#allocation5], 1 }
  0xef   :  { %569 = vsyncpa [#allocation5 + $0x1], 1 }
  0xf0   :  { %570 = vsyncpa [#allocation6], 1 }
  0xf1   :  { %572 = vsyncpa [#allocation6 + $0x1], 1 }
  0xf2   :  { %573 = vsyncpa [#allocation10], 1 }

</bundles_post_ra>
